<compile_context>
chip_gen: v7x
topology: tpu7x:2x2x1
jax: 0.10.0
libtpu: 0.0.40
codegen_flags: <defaults>
</compile_context>

<pallas_src>
import functools
import math

import numpy as np
import jax
import jax.numpy as jnp
from jax import lax
from jax.experimental import pallas as pl
from jax.experimental.pallas import tpu as pltpu


_MAX_TILE_ROWS = 32768


def _cdiv(a, b):
    return -(-a // b)


@functools.lru_cache(maxsize=1)
def _chip_config():
    """Generation-aware tile / VMEM-limit / path defaults."""
    kind = ""
    try:
        kind = (jax.devices()[0].device_kind or "").lower()
    except Exception:
        pass
    vmem_cap = None
    try:
        vmem_cap = int(pltpu.get_tpu_info().vmem_capacity_bytes)
    except Exception:
        vmem_cap = None

    is_v7 = ("v7" in kind) or ("7x" in kind)
    big_vmem = ((vmem_cap is not None and vmem_cap >= 100 * 2 ** 20) or
                (vmem_cap is None and not is_v7 and ("v5" in kind or "v6" in kind)))

    if is_v7:
        # 64 MiB VMEM per TC: cap tiles + scoped limit; 2 TCs -> prefer split path.
        cfg = dict(tile_bytes=2 * 2 ** 20, vmem_limit=48 * 2 ** 20, fuse_default=False)
    elif big_vmem:
        # v5e / v6e: 128 MiB physical VMEM; bigger tiles amortize per-step overhead.
        cfg = dict(tile_bytes=8 * 2 ** 20, vmem_limit=64 * 2 ** 20, fuse_default=True)
    else:
        cfg = dict(tile_bytes=2 * 2 ** 20, vmem_limit=32 * 2 ** 20, fuse_default=True)
    cfg["small_bytes"] = cfg["vmem_limit"] // 5     # VMEM-resident single-read gate
    return cfg


def _pack_factor(feat):
    """Minimal rows-per-packed-row so the packed lane width is a 128 multiple."""
    if feat % 128 == 0:
        return 1
    return 128 // math.gcd(feat, 128)


def _tile_rows(rows_packed, width, tile_bytes, override=None):
    if override is not None:
        return max(8, (int(override) // 8) * 8)
    t = max(8, tile_bytes // (width * 4))
    t = min(t, _MAX_TILE_ROWS)
    t = min(t, max(8, _cdiv(rows_packed, 8) * 8))   # don't tile past the data
    return max(8, (t // 8) * 8)


def _fold_replicated(v, feat, width):
    """Sum the k = width//feat interleaved lane groups of `v`.

    Returns per-feature totals already replicated k times along lanes.
    log2(k) XLU rolls; exact because k is a power of two."""
    shift = feat
    axis = v.ndim - 1
    while shift < width:
        v = v + pltpu.roll(v, shift=shift, axis=axis)
        shift *= 2
    return v


def _tile_row(v_feat, k):
    """(feat,) -> (1, k*feat) per-feature values replicated across lane groups."""
    return jnp.tile(v_feat.reshape(1, -1), (1, k))


def _stats_feat(rs_feat, rss_feat, num_accum, eps):
    """Per-feature mean / 1/std from running stats (variance clamped >= 0)."""
    inv_n = 1.0 / float(max(int(num_accum), 1))
    mean = rs_feat * inv_n
    var = jnp.maximum(rss_feat * inv_n - mean * mean, 0.0)
    inv_std = 1.0 / jnp.maximum(jnp.sqrt(var), jnp.float32(eps))
    return mean, inv_std


# --------------------------------------------------------------------------
# VMEM-resident single-read fused kernel (small/medium inputs): 2 HBM passes.
# --------------------------------------------------------------------------
def _small_fused_kernel(x_ref, rs_ref, rss_ref, invn_ref,
                        o_ref, nrs_ref, nrss_ref, *, feat, eps, width):
    xt = x_ref[...].astype(jnp.float32)
    s = _fold_replicated(jnp.sum(xt, axis=0, keepdims=True), feat, width) + rs_ref[...]
    ss = _fold_replicated(jnp.sum(xt * xt, axis=0, keepdims=True), feat, width) + rss_ref[...]
    nrs_ref[...] = s
    nrss_ref[...] = ss
    inv_n = invn_ref[0, 0]
    mean = s * inv_n
    var = jnp.maximum(ss * inv_n - mean * mean, 0.0)      # clamp: no NaN on cancellation
    inv_std = 1.0 / jnp.maximum(jnp.sqrt(var), jnp.float32(eps))
    o_ref[...] = ((xt - mean) * inv_std).astype(o_ref.dtype)


def _small_fused_call(x_packed, rs_t, rss_t, invn_arr, *, feat, eps, out_dtype, vmem_limit):
    rows_packed, width = x_packed.shape
    kern = functools.partial(_small_fused_kernel, feat=feat, eps=eps, width=width)
    return pl.pallas_call(
        kern,
        out_shape=(jax.ShapeDtypeStruct((rows_packed, width), out_dtype),
                   jax.ShapeDtypeStruct((1, width), jnp.float32),
                   jax.ShapeDtypeStruct((1, width), jnp.float32)),
        grid_spec=pltpu.PrefetchScalarGridSpec(
            num_scalar_prefetch=0,
            grid=(1,),
            in_specs=[pl.BlockSpec((rows_packed, width), lambda i: (0, 0)),
                      pl.BlockSpec((1, width), lambda i: (0, 0)),
                      pl.BlockSpec((1, width), lambda i: (0, 0)),
                      pl.BlockSpec((1, 1), lambda i: (0, 0))],
            out_specs=(pl.BlockSpec((rows_packed, width), lambda i: (0, 0)),
                       pl.BlockSpec((1, width), lambda i: (0, 0)),
                       pl.BlockSpec((1, width), lambda i: (0, 0)))),
        compiler_params=pltpu.CompilerParams(
            dimension_semantics=("arbitrary",),
            vmem_limit_bytes=vmem_limit),
    )(x_packed, rs_t, rss_t, invn_arr)


def _small_normalize_kernel(x_ref, mean_ref, inv_ref, o_ref):
    xt = x_ref[...].astype(jnp.float32)
    o_ref[...] = ((xt - mean_ref[...]) * inv_ref[...]).astype(o_ref.dtype)


def _small_normalize_call(x_packed, mean_t, inv_t, out_dtype, vmem_limit):
    rows_packed, width = x_packed.shape
    return pl.pallas_call(
        _small_normalize_kernel,
        out_shape=jax.ShapeDtypeStruct((rows_packed, width), out_dtype),
        grid_spec=pltpu.PrefetchScalarGridSpec(
            num_scalar_prefetch=0,
            grid=(1,),
            in_specs=[pl.BlockSpec((rows_packed, width), lambda i: (0, 0)),
                      pl.BlockSpec((1, width), lambda i: (0, 0)),
                      pl.BlockSpec((1, width), lambda i: (0, 0))],
            out_specs=pl.BlockSpec((rows_packed, width), lambda i: (0, 0))),
        compiler_params=pltpu.CompilerParams(
            dimension_semantics=("arbitrary",),
            vmem_limit_bytes=vmem_limit),
    )(x_packed, mean_t, inv_t)


# --------------------------------------------------------------------------
# Streaming fused reduce + normalize kernel (large inputs on single-TC chips).
# --------------------------------------------------------------------------
def _fused_kernel(x_ref, rs_ref, rss_ref, invn_ref,
                  o_ref, nrs_ref, nrss_ref,
                  acc_s, acc_ss, mean8, inv8,
                  *, feat, eps, tile_r, width, rows_packed, needs_mask):
    p = pl.program_id(0)          # 0: reduction pass, 1: normalization pass
    i = pl.program_id(1)
    n_tiles = _cdiv(rows_packed, tile_r)

    @pl.when((p == 0) & (i == 0))
    def _init():
        acc_s[...] = jnp.zeros_like(acc_s)
        acc_ss[...] = jnp.zeros_like(acc_ss)
        # o_ref is parked on block 0 during pass 0; give it a defined value once so
        # any (future-semantics) early writeback is benign.  Costs one VMEM memset.
        o_ref[...] = jnp.zeros_like(o_ref)

    def _accum(xt):
        x3 = xt.reshape(tile_r // 8, 8, width)
        acc_s[...] += jnp.sum(x3, axis=0)           # pure VPU adds (no XLU in loop)
        acc_ss[...] += jnp.sum(x3 * x3, axis=0)

    if needs_mask:
        # Row mask only on the final partial tile; interior tiles are raw loads.
        @pl.when((p == 0) & (i < n_tiles - 1))
        def _reduce_interior():
            _accum(x_ref[...].astype(jnp.float32))

        @pl.when((p == 0) & (i == n_tiles - 1))
        def _reduce_last():
            xt = x_ref[...].astype(jnp.float32)
            row = (lax.broadcasted_iota(jnp.int32, (tile_r, 1), 0)
                   + (n_tiles - 1) * tile_r)
            _accum(jnp.where(row < rows_packed, xt, 0.0))
    else:
        @pl.when(p == 0)
        def _reduce():
            _accum(x_ref[...].astype(jnp.float32))

    @pl.when((p == 0) & (i == n_tiles - 1))
    def _finalize_stats():
        # one-time: fold lane groups, cross-sublane reduce, add running stats
        s8 = _fold_replicated(acc_s[...], feat, width)
        ss8 = _fold_replicated(acc_ss[...], feat, width)
        tot_s = jnp.sum(s8, axis=0, keepdims=True) + rs_ref[...]      # (1, W)
        tot_ss = jnp.sum(ss8, axis=0, keepdims=True) + rss_ref[...]   # (1, W)
        nrs_ref[...] = tot_s
        nrss_ref[...] = tot_ss
        inv_n = invn_ref[0, 0]
        mean = tot_s * inv_n
        var = jnp.maximum(tot_ss * inv_n - mean * mean, 0.0)
        inv_std = 1.0 / jnp.maximum(jnp.sqrt(var), jnp.float32(eps))
        mean8[...] = jnp.broadcast_to(mean, (8, width))       # broadcast once
        inv8[...] = jnp.broadcast_to(inv_std, (8, width))

    @pl.when(p == 1)
    def _normalize():
        x3 = x_ref[...].astype(jnp.float32).reshape(tile_r // 8, 8, width)
        o3 = (x3 - mean8[...][None]) * inv8[...][None]
        o_ref[...] = o3.reshape(tile_r, width).astype(o_ref.dtype)


def _fused_call(x_packed, rs_t, rss_t, invn_arr, *, feat, eps, tile_r, out_dtype,
                vmem_limit):
    rows_packed, width = x_packed.shape
    n_tiles = _cdiv(rows_packed, tile_r)
    needs_mask = (rows_packed % tile_r) != 0
    kern = functools.partial(_fused_kernel, feat=feat, eps=eps, tile_r=tile_r,
                             width=width, rows_packed=rows_packed,
                             needs_mask=needs_mask)
    return pl.pallas_call(
        kern,
        out_shape=(jax.ShapeDtypeStruct((rows_packed, width), out_dtype),
                   jax.ShapeDtypeStruct((1, width), jnp.float32),
                   jax.ShapeDtypeStruct((1, width), jnp.float32)),
        grid_spec=pltpu.PrefetchScalarGridSpec(
            num_scalar_prefetch=0,
            grid=(2, n_tiles),
            in_specs=[pl.BlockSpec((tile_r, width), lambda p, i: (i, 0)),
                      pl.BlockSpec((1, width), lambda p, i: (0, 0)),
                      pl.BlockSpec((1, width), lambda p, i: (0, 0)),
                      pl.BlockSpec((1, 1), lambda p, i: (0, 0))],
            out_specs=(
                # pass 0: park on block 0 (written once at init); pass 1: stream out.
                pl.BlockSpec((tile_r, width), lambda p, i: (i * p, 0)),
                pl.BlockSpec((1, width), lambda p, i: (0, 0)),
                pl.BlockSpec((1, width), lambda p, i: (0, 0))),
            scratch_shapes=[pltpu.VMEM((8, width), jnp.float32),
                            pltpu.VMEM((8, width), jnp.float32),
                            pltpu.VMEM((8, width), jnp.float32),
                            pltpu.VMEM((8, width), jnp.float32)]),
        compiler_params=pltpu.CompilerParams(
            dimension_semantics=("arbitrary", "arbitrary"),
            vmem_limit_bytes=vmem_limit),
    )(x_packed, rs_t, rss_t, invn_arr)


# --------------------------------------------------------------------------
# Split reduce kernel (fuse=False path; leading axis is core-parallel on v7x).
# --------------------------------------------------------------------------
def _reduce_split_kernel(x_ref, ps_ref, pss_ref, acc_s, acc_ss,
                         *, tile_r, width, rows_packed, n_blocks,
                         tiles_per_split, needs_mask):
    s = pl.program_id(0)
    i = pl.program_id(1)
    g = s * tiles_per_split + i
    last = n_blocks - 1

    @pl.when(i == 0)
    def _init():
        acc_s[...] = jnp.zeros_like(acc_s)
        acc_ss[...] = jnp.zeros_like(acc_ss)

    def _accum(xt):
        x3 = xt.reshape(tile_r // 8, 8, width)
        acc_s[...] += jnp.sum(x3, axis=0)
        acc_ss[...] += jnp.sum(x3 * x3, axis=0)

    if needs_mask:
        @pl.when(g < last)
        def _interior():
            _accum(x_ref[...].astype(jnp.float32))

        @pl.when(g == last)
        def _last():
            xt = x_ref[...].astype(jnp.float32)
            row = lax.broadcasted_iota(jnp.int32, (tile_r, 1), 0) + last * tile_r
            _accum(jnp.where(row < rows_packed, xt, 0.0))
        # g > last (fully out-of-range tile assigned to a ragged split): skipped.
    else:
        @pl.when(g <= last)
        def _all():
            _accum(x_ref[...].astype(jnp.float32))

    @pl.when(i == tiles_per_split - 1)
    def _flush():
        ps_ref[...] = jnp.sum(acc_s[...], axis=0, keepdims=True)[None]
        pss_ref[...] = jnp.sum(acc_ss[...], axis=0, keepdims=True)[None]


def _reduce_split_call(x_packed, tile_r, n_split, vmem_limit):
    rows_packed, width = x_packed.shape
    n_blocks = _cdiv(rows_packed, tile_r)
    n_split = max(1, min(int(n_split), n_blocks))
    tiles_per_split = _cdiv(n_blocks, n_split)
    needs_mask = (rows_packed % tile_r) != 0
    last_block = n_blocks - 1

    def x_map(s, i):
        # Ragged splits may be assigned fully-OOB tiles; clamp the DMA to the last
        # real block — the kernel skips their contribution.
        return (jnp.minimum(s * tiles_per_split + i, last_block), 0)

    kern = functools.partial(_reduce_split_kernel, tile_r=tile_r, width=width,
                             rows_packed=rows_packed, n_blocks=n_blocks,
                             tiles_per_split=tiles_per_split, needs_mask=needs_mask)
    return pl.pallas_call(
        kern,
        out_shape=(jax.ShapeDtypeStruct((n_split, 1, width), jnp.float32),
                   jax.ShapeDtypeStruct((n_split, 1, width), jnp.float32)),
        grid_spec=pltpu.PrefetchScalarGridSpec(
            num_scalar_prefetch=0,
            grid=(n_split, tiles_per_split),
            in_specs=[pl.BlockSpec((tile_r, width), x_map)],
            out_specs=(pl.BlockSpec((1, 1, width), lambda s, i: (s, 0, 0)),
                       pl.BlockSpec((1, 1, width), lambda s, i: (s, 0, 0))),
            scratch_shapes=[pltpu.VMEM((8, width), jnp.float32),
                            pltpu.VMEM((8, width), jnp.float32)]),
        compiler_params=pltpu.CompilerParams(
            dimension_semantics=("parallel", "arbitrary"),   # v7x: shard over 2 TCs
            vmem_limit_bytes=vmem_limit),
    )(x_packed)


# --------------------------------------------------------------------------
# Streaming normalize-only kernel (frozen path / second half of fuse=False path).
# --------------------------------------------------------------------------
def _normalize_kernel(x_ref, mean_ref, inv_ref, o_ref, *, tile_r, width):
    x3 = x_ref[...].astype(jnp.float32).reshape(tile_r // 8, 8, width)
    o3 = (x3 - mean_ref[...][None]) * inv_ref[...][None]
    o_ref[...] = o3.reshape(tile_r, width).astype(o_ref.dtype)


def _normalize_call(x_packed, mean8, inv8, tile_r, out_dtype, vmem_limit):
    rows_packed, width = x_packed.shape
    n_tiles = _cdiv(rows_packed, tile_r)
    kern = functools.partial(_normalize_kernel, tile_r=tile_r, width=width)
    return pl.pallas_call(
        kern,
        out_shape=jax.ShapeDtypeStruct((rows_packed, width), out_dtype),
        grid_spec=pltpu.PrefetchScalarGridSpec(
            num_scalar_prefetch=0,
            grid=(n_tiles,),
            in_specs=[pl.BlockSpec((tile_r, width), lambda i: (i, 0)),
                      pl.BlockSpec((8, width), lambda i: (0, 0)),
                      pl.BlockSpec((8, width), lambda i: (0, 0))],
            out_specs=pl.BlockSpec((tile_r, width), lambda i: (i, 0))),
        compiler_params=pltpu.CompilerParams(
            dimension_semantics=("parallel",),
            vmem_limit_bytes=vmem_limit),
    )(x_packed, mean8, inv8)


# --------------------------------------------------------------------------
# Wrapper
# --------------------------------------------------------------------------
def invertable_norm_forward(x, running_sum, running_sum_sq, num_accum, accum_count,
                            shape, eps=1e-8, max_accumulations=10 ** 6, frozen=False,
                            *, fuse=None, n_split=2, _force_streaming=False,
                            _tile_rows_override=None):
    """Functional equivalent of InvertableNorm.forward.

    Returns (normalized_x, (running_sum, running_sum_sq, num_accum, accum_count)).
    `num_accum` / `accum_count` are host-side Python ints (torch uses .item())."""
    shape = tuple(shape)
    assert x.shape[x.ndim - len(shape):] == shape
    feat = int(np.prod(shape))
    n_batch_dims = x.ndim - len(shape)
    rows = int(np.prod(x.shape[:n_batch_dims])) if n_batch_dims > 0 else 1
    out_dtype = jnp.promote_types(x.dtype, jnp.float32)   # matches torch f32 buffers

    cfg = _chip_config()
    do_fuse = cfg["fuse_default"] if fuse is None else bool(fuse)
    vmem_limit = cfg["vmem_limit"]

    k = _pack_factor(feat)
    width = k * feat
    rows_main = (rows // k) * k
    rem = rows - rows_main

    x2d = x.reshape(rows, feat)                          # bitcast reshape (free)
    rs = running_sum.reshape(feat).astype(jnp.float32)
    rss = running_sum_sq.reshape(feat).astype(jnp.float32)

    accumulate = (int(accum_count) < max_accumulations) and (not frozen)
    num_accum_new = int(num_accum) + (rows if accumulate else 0)
    accum_count_new = int(accum_count) + (1 if accumulate else 0)
    inv_n = 1.0 / float(max(num_accum_new, 1))

    # Degenerate case: fewer rows than one packed row -> plain JAX (tiny data).
    if rows_main == 0:
        xf = x2d.astype(jnp.float32)
        if accumulate:
            new_rs = rs + xf.sum(axis=0)
            new_rss = rss + (xf * xf).sum(axis=0)
        else:
            new_rs, new_rss = rs, rss
        mean_f, inv_f = _stats_feat(new_rs, new_rss, num_accum_new, eps)
        out = ((xf - mean_f) * inv_f).astype(out_dtype).reshape(x.shape)
        return out, (new_rs.reshape(shape).astype(running_sum.dtype),
                     new_rss.reshape(shape).astype(running_sum_sq.dtype),
                     num_accum_new, accum_count_new)

    # Bulk: pure bitcast reshape to the lane-dense packed view when rows % k == 0.
    if rem == 0:
        x_bulk = x2d
    else:
        # TODO(synk): XLA may materialize this prefix slice (one extra pass over the
        # bulk); a truly copy-free ragged path needs a flat / manual-DMA layout.
        x_bulk = x2d[:rows_main]
    rows_packed = rows_main // k
    x_packed = x_bulk.reshape(rows_packed, width)

    tile_r = _tile_rows(rows_packed, width, cfg["tile_bytes"], _tile_rows_override)
    small = (not _force_streaming) and (rows_packed * width * 4 <= cfg["small_bytes"])

    tail_f = x2d[rows_main:].astype(jnp.float32) if rem else None   # (<k, feat)

    mean_f = inv_f = None
    if accumulate:
        rs_eff, rss_eff = rs, rss
        if rem:
            # Tiny tail epilogue: its sums are folded into the stats fed to the kernel.
            rs_eff = rs + tail_f.sum(axis=0)
            rss_eff = rss + (tail_f * tail_f).sum(axis=0)
        rs_t = _tile_row(rs_eff, k)
        rss_t = _tile_row(rss_eff, k)
        invn_arr = jnp.full((1, 1), inv_n, jnp.float32)
        if small:
            out_packed, nrs_t, nrss_t = _small_fused_call(
                x_packed, rs_t, rss_t, invn_arr, feat=feat, eps=eps,
                out_dtype=out_dtype, vmem_limit=vmem_limit)
            new_rs, new_rss = nrs_t[0, :feat], nrss_t[0, :feat]
        elif do_fuse:
            out_packed, nrs_t, nrss_t = _fused_call(
                x_packed, rs_t, rss_t, invn_arr, feat=feat, eps=eps, tile_r=tile_r,
                out_dtype=out_dtype, vmem_limit=vmem_limit)
            new_rs, new_rss = nrs_t[0, :feat], nrss_t[0, :feat]
        else:
            ps, pss = _reduce_split_call(x_packed, tile_r, n_split, vmem_limit)
            new_rs = rs_eff + ps.sum(axis=(0, 1)).reshape(k, feat).sum(axis=0)
            new_rss = rss_eff + pss.sum(axis=(0, 1)).reshape(k, feat).sum(axis=0)
            mean_f, inv_f = _stats_feat(new_rs, new_rss, num_accum_new, eps)
            mean8 = jnp.broadcast_to(_tile_row(mean_f, k), (8, width))
            inv8 = jnp.broadcast_to(_tile_row(inv_f, k), (8, width))
            out_packed = _normalize_call(x_packed, mean8, inv8, tile_r,
                                         out_dtype, vmem_limit)
    else:
        new_rs, new_rss = rs, rss
        mean_f, inv_f = _stats_feat(rs, rss, num_accum_new, eps)
        if small:
            out_packed = _small_normalize_call(
                x_packed, _tile_row(mean_f, k), _tile_row(inv_f, k),
                out_dtype, vmem_limit)
        else:
            mean8 = jnp.broadcast_to(_tile_row(mean_f, k), (8, width))
            inv8 = jnp.broadcast_to(_tile_row(inv_f, k), (8, width))
            out_packed = _normalize_call(x_packed, mean8, inv8, tile_r,
                                         out_dtype, vmem_limit)

    out2d = out_packed.reshape(rows_main, feat)          # bitcast reshape (free)
    if rem:
        if mean_f is None:
            mean_f, inv_f = _stats_feat(new_rs, new_rss, num_accum_new, eps)
        out_tail = ((tail_f - mean_f) * inv_f).astype(out_dtype)
        # TODO(synk): this concatenate re-copies the bulk output once; only hit when
        # rows % k != 0.
        out2d = jnp.concatenate([out2d, out_tail], axis=0)
    out = out2d.reshape(x.shape)
    new_state = (new_rs.reshape(shape).astype(running_sum.dtype),
                 new_rss.reshape(shape).astype(running_sum_sq.dtype),
                 num_accum_new, accum_count_new)
    return out, new_state


if __name__ == "__main__":
    shape = (32,)
    feat = 32
    eps = 1e-8
    TOL = dict(rtol=2e-4, atol=2e-4)

    def np_forward(x_np, rs, rss, num, accumulate):
        x32 = np.asarray(x_np, np.float32)
        x2 = x32.reshape(-1, feat)
        rs = np.asarray(rs, np.float32).copy()
        rss = np.asarray(rss, np.float32).copy()
        if accumulate:
            rs = rs + x2.sum(0)
            rss = rss + (x2 * x2).sum(0)
            num = num + x2.shape[0]
        n = max(num, 1)
        mean = rs / n
        std = np.maximum(np.sqrt(np.maximum(rss / n - mean * mean, 0.0)), eps)
        out = (x32 - mean) / std
        return out, rs, rss, num

    def run_and_check(tag, x, rs, rss, num, cnt, frozen=False, max_acc=10 ** 6, **kw):
        out, (nrs, nrss, nnum, ncnt) = invertable_norm_forward(
            x, jnp.asarray(rs), jnp.asarray(rss), num, cnt, shape,
            eps=eps, max_accumulations=max_acc, frozen=frozen, **kw)
        out = jax.block_until_ready(out)
        accumulate = (cnt < max_acc) and (not frozen)
        ref_out, ref_rs, ref_rss, ref_num = np_forward(x, rs, rss, num, accumulate)
        np.testing.assert_allclose(np.asarray(out), ref_out, err_msg=tag, **TOL)
        np.testing.assert_allclose(np.asarray(nrs), ref_rs, err_msg=tag, **TOL)
        np.testing.assert_allclose(np.asarray(nrss), ref_rss, err_msg=tag, **TOL)
        assert nnum == ref_num, tag
        assert ncnt == cnt + (1 if accumulate else 0), tag
        return np.asarray(nrs), np.asarray(nrss), nnum, ncnt

    zeros = np.zeros(shape, np.float32)

    # (1) VMEM-resident single-read fused path (default), rows % k == 0 -> zero-copy
    x1 = jax.random.normal(jax.random.PRNGKey(0), (2, 8, 32), dtype=jnp.float32)
    rs1, rss1, n1, c1 = run_and_check("small-fused", x1, zeros, zeros, 0, 0)

    # (2) second accumulation into existing running stats (same input)
    run_and_check("small-fused-accum2", x1, rs1, rss1, n1, c1)

    # (3) frozen: buffers untouched, normalize with existing stats (small path)
    run_and_check("small-frozen", x1, rs1, rss1, n1, c1, frozen=True)

    # (4) max_accumulations reached: behaves like frozen
    run_and_check("max-accum-reached", x1, rs1, rss1, n1, 5, max_acc=5)

    # (5) streaming fused path (v5e/v6e default), multi-tile with masked last tile
    x2 = jax.random.normal(jax.random.PRNGKey(1), (16, 33, 32), dtype=jnp.float32)
    run_and_check("stream-fused", x2, zeros, zeros, 0, 0,
                  fuse=True, _force_streaming=True, _tile_rows_override=64)

    # (6) split-reduce + streaming-normalize path (v7x default, 'parallel' lead axis)
    run_and_check("stream-split", x2, zeros, zeros, 0, 0,
                  fuse=False, _force_streaming=True, _tile_rows_override=64)

    # (7) frozen streaming normalize
    run_and_check("stream-frozen", x2, rs1, rss1, n1, c1, frozen=True,
                  _force_streaming=True, _tile_rows_override=64)

    # (8) ragged rows (rows % k != 0): bulk through the kernel, tiny tail epilogue
    x3 = jax.random.normal(jax.random.PRNGKey(2), (2, 7, 32), dtype=jnp.float32)
    run_and_check("ragged-small", x3, zeros, zeros, 0, 0)
    run_and_check("ragged-stream", x3, zeros, zeros, 0, 0,
                  fuse=True, _force_streaming=True)

    # (9) bf16 input (output promoted to f32, matching torch's f32-buffer promotion)
    x4 = jax.random.normal(jax.random.PRNGKey(3), (4, 16, 32), dtype=jnp.bfloat16)
    run_and_check("bf16-small", x4, zeros, zeros, 0, 0)

    print("KERNEL_OK")
</pallas_src>

<mosaic_0001>
module attributes {stable_mosaic.version = 11 : i64} {
  func.func @_small_fused_kernel(%arg0: i32, %arg1: memref<4x128xf32, #tpu.memory_space<vmem>>, %arg2: memref<1x128xf32, #tpu.memory_space<vmem>>, %arg3: memref<1x128xf32, #tpu.memory_space<vmem>>, %arg4: memref<1x1xf32, #tpu.memory_space<vmem>>, %arg5: memref<4x128xf32, #tpu.memory_space<vmem>>, %arg6: memref<1x128xf32, #tpu.memory_space<vmem>>, %arg7: memref<1x128xf32, #tpu.memory_space<vmem>>) attributes {dimension_semantics = [#tpu.dimension_semantics<arbitrary>], iteration_bounds = array<i64: 1>, scalar_prefetch = 0 : i64, scratch_operands = 0 : i64, tpu.core_type = #tpu.core_type<tc>, window_params = [{pipeline_mode = #tpu.pipeline_mode<synchronous>, transform_indices = @transform_0, window_bounds = array<i64: 4, 128>}, {pipeline_mode = #tpu.pipeline_mode<synchronous>, transform_indices = @transform_1, window_bounds = array<i64: 1, 128>}, {pipeline_mode = #tpu.pipeline_mode<synchronous>, transform_indices = @transform_2, window_bounds = array<i64: 1, 128>}, {pipeline_mode = #tpu.pipeline_mode<synchronous>, transform_indices = @transform_3, window_bounds = array<i64: 1, 1>}, {pipeline_mode = #tpu.pipeline_mode<synchronous>, transform_indices = @transform_4, window_bounds = array<i64: 4, 128>}, {pipeline_mode = #tpu.pipeline_mode<synchronous>, transform_indices = @transform_5, window_bounds = array<i64: 1, 128>}, {pipeline_mode = #tpu.pipeline_mode<synchronous>, transform_indices = @transform_6, window_bounds = array<i64: 1, 128>}]} {
    %c0 = arith.constant 0 : index
    %c0_0 = arith.constant 0 : index
    %0 = vector.load %arg1[%c0, %c0_0] : memref<4x128xf32, #tpu.memory_space<vmem>>, vector<4x128xf32>
    %cst = arith.constant dense<0.000000e+00> : vector<128xf32>
    %1 = vector.multi_reduction <add>, %0, %cst [0] : vector<4x128xf32> to vector<128xf32>
    %2 = vector.shape_cast %1 : vector<128xf32> to vector<1x128xf32>
    %c32_i32 = arith.constant 32 : i32
    %3 = tpu.dynamic_rotate %2 by %c32_i32 dim 1 : vector<1x128xf32>, i32 -> vector<1x128xf32>
    %4 = arith.addf %2, %3 : vector<1x128xf32>
    %c64_i32 = arith.constant 64 : i32
    %5 = tpu.dynamic_rotate %4 by %c64_i32 dim 1 : vector<1x128xf32>, i32 -> vector<1x128xf32>
    %6 = arith.addf %4, %5 : vector<1x128xf32>
    %c0_1 = arith.constant 0 : index
    %c0_2 = arith.constant 0 : index
    %7 = vector.load %arg2[%c0_1, %c0_2] : memref<1x128xf32, #tpu.memory_space<vmem>>, vector<1x128xf32>
    %8 = arith.addf %6, %7 : vector<1x128xf32>
    %9 = arith.mulf %0, %0 : vector<4x128xf32>
    %cst_3 = arith.constant dense<0.000000e+00> : vector<128xf32>
    %10 = vector.multi_reduction <add>, %9, %cst_3 [0] : vector<4x128xf32> to vector<128xf32>
    %11 = vector.shape_cast %10 : vector<128xf32> to vector<1x128xf32>
    %c32_i32_4 = arith.constant 32 : i32
    %12 = tpu.dynamic_rotate %11 by %c32_i32_4 dim 1 : vector<1x128xf32>, i32 -> vector<1x128xf32>
    %13 = arith.addf %11, %12 : vector<1x128xf32>
    %c64_i32_5 = arith.constant 64 : i32
    %14 = tpu.dynamic_rotate %13 by %c64_i32_5 dim 1 : vector<1x128xf32>, i32 -> vector<1x128xf32>
    %15 = arith.addf %13, %14 : vector<1x128xf32>
    %c0_6 = arith.constant 0 : index
    %c0_7 = arith.constant 0 : index
    %16 = vector.load %arg3[%c0_6, %c0_7] : memref<1x128xf32, #tpu.memory_space<vmem>>, vector<1x128xf32>
    %17 = arith.addf %15, %16 : vector<1x128xf32>
    %c0_8 = arith.constant 0 : index
    %c0_9 = arith.constant 0 : index
    %18 = vector.load %arg6[%c0_8, %c0_9] : memref<1x128xf32, #tpu.memory_space<vmem>>, vector<1x128xf32>
    tpu.vector_store %arg6[%c0_8, %c0_9], %8 {strides = array<i32>} : memref<1x128xf32, #tpu.memory_space<vmem>>, vector<1x128xf32>,
    %c0_10 = arith.constant 0 : index
    %c0_11 = arith.constant 0 : index
    %19 = vector.load %arg7[%c0_10, %c0_11] : memref<1x128xf32, #tpu.memory_space<vmem>>, vector<1x128xf32>
    tpu.vector_store %arg7[%c0_10, %c0_11], %17 {strides = array<i32>} : memref<1x128xf32, #tpu.memory_space<vmem>>, vector<1x128xf32>,
    %c0_12 = arith.constant 0 : index
    %c0_13 = arith.constant 0 : index
    %20 = vector.load %arg4[%c0_12, %c0_13] : memref<1x1xf32, #tpu.memory_space<vmem>>, vector<1x1xf32>
    %21 = vector.extract %20[0, 0] : f32 from vector<1x1xf32>
    %22 = vector.broadcast %21 : f32 to vector<1x128xf32>
    %23 = arith.mulf %8, %22 : vector<1x128xf32>
    %24 = vector.broadcast %21 : f32 to vector<1x128xf32>
    %25 = arith.mulf %17, %24 : vector<1x128xf32>
    %26 = arith.mulf %23, %23 : vector<1x128xf32>
    %27 = arith.subf %25, %26 : vector<1x128xf32>
    %cst_14 = arith.constant 0.000000e+00 : f32
    %28 = vector.broadcast %cst_14 : f32 to vector<1x128xf32>
    %29 = arith.maximumf %27, %28 : vector<1x128xf32>
    %30 = math.sqrt %29 : vector<1x128xf32>
    %cst_15 = arith.constant 9.99999993E-9 : f32
    %31 = vector.broadcast %cst_15 : f32 to vector<1x128xf32>
    %32 = arith.maximumf %30, %31 : vector<1x128xf32>
    %cst_16 = arith.constant 1.000000e+00 : f32
    %33 = vector.broadcast %cst_16 : f32 to vector<1x128xf32>
    %34 = arith.divf %33, %32 : vector<1x128xf32>
    %35 = vector.broadcast %23 : vector<1x128xf32> to vector<4x128xf32>
    %36 = arith.subf %0, %35 : vector<4x128xf32>
    %37 = vector.broadcast %34 : vector<1x128xf32> to vector<4x128xf32>
    %38 = arith.mulf %36, %37 : vector<4x128xf32>
    %c0_17 = arith.constant 0 : index
    %c0_18 = arith.constant 0 : index
    %39 = vector.load %arg5[%c0_17, %c0_18] : memref<4x128xf32, #tpu.memory_space<vmem>>, vector<4x128xf32>
    tpu.vector_store %arg5[%c0_17, %c0_18], %38 {strides = array<i32>} : memref<4x128xf32, #tpu.memory_space<vmem>>, vector<4x128xf32>,
    return
  }
  func.func @transform_0(%arg0: i32) -> (i32, i32) {
    %c0_i32 = arith.constant 0 : i32
    %c0_i32_0 = arith.constant 0 : i32
    %c0_i32_1 = arith.constant 0 : i32
    return %c0_i32, %c0_i32_0 : i32, i32
  }
  func.func @transform_1(%arg0: i32) -> (i32, i32) {
    %c0_i32 = arith.constant 0 : i32
    %c0_i32_0 = arith.constant 0 : i32
    %c0_i32_1 = arith.constant 0 : i32
    return %c0_i32, %c0_i32_0 : i32, i32
  }
  func.func @transform_2(%arg0: i32) -> (i32, i32) {
    %c0_i32 = arith.constant 0 : i32
    %c0_i32_0 = arith.constant 0 : i32
    %c0_i32_1 = arith.constant 0 : i32
    return %c0_i32, %c0_i32_0 : i32, i32
  }
  func.func @transform_3(%arg0: i32) -> (i32, i32) {
    %c0_i32 = arith.constant 0 : i32
    %c0_i32_0 = arith.constant 0 : i32
    %c0_i32_1 = arith.constant 0 : i32
    return %c0_i32, %c0_i32_0 : i32, i32
  }
  func.func @transform_4(%arg0: i32) -> (i32, i32) {
    %c0_i32 = arith.constant 0 : i32
    %c0_i32_0 = arith.constant 0 : i32
    %c0_i32_1 = arith.constant 0 : i32
    return %c0_i32, %c0_i32_0 : i32, i32
  }
  func.func @transform_5(%arg0: i32) -> (i32, i32) {
    %c0_i32 = arith.constant 0 : i32
    %c0_i32_0 = arith.constant 0 : i32
    %c0_i32_1 = arith.constant 0 : i32
    return %c0_i32, %c0_i32_0 : i32, i32
  }
  func.func @transform_6(%arg0: i32) -> (i32, i32) {
    %c0_i32 = arith.constant 0 : i32
    %c0_i32_0 = arith.constant 0 : i32
    %c0_i32_1 = arith.constant 0 : i32
    return %c0_i32, %c0_i32_0 : i32, i32
  }
}

</mosaic_0001>

<bundles_post_ra>
// kernel: tpu_custom_call.1
= control target key start
LH: loop header
LB: loop body
LE: loop exit
PB: predicated region body
PF: predicated region fallthrough
CT: control target
= control target key end

     0   :  { %s355_s0 = inlined_call_operand.hbm [shape: f32[4,128], index: 0, kind: input, shape index: {}]   ;;  %s356_s1 = inlined_call_operand.vmem [shape: f32[1,128], index: 1, kind: input, shape index: {}]   ;;  %s357_s2 = inlined_call_operand.vmem [shape: f32[1,128], index: 2, kind: input, shape index: {}]   ;;  %s358_s3 = inlined_call_operand.<no memory space> [shape: f32[1,1], index: 3, kind: input, shape index: {}]   ;;  %s359_s4 = inlined_call_operand.hbm [shape: f32[4,128], index: 4, kind: output, shape index: {0}]   ;;  %s360_s5 = inlined_call_operand.hbm [shape: f32[1,128], index: 5, kind: output, shape index: {1}]   ;;  %s361_s6 = inlined_call_operand.hbm [shape: f32[1,128], index: 6, kind: output, shape index: {2}]  }
   0x1   :  { %v12_v0 = vstv %s358_s3 }
   0x2   :  { %13 = vst [vmem:[#allocation2] sm:$0x1] %v12_v0 }
   0x3   :  { %14 = vsyncpa [#allocation4], 0 }
   0x4   :  { %15 = vsyncpa [#allocation5], 0 }
   0x5   :  { %16 = vsyncpa [#allocation8], 0  ;;  %s248_s23 = smov [#allocation3]   ;;  %s154_s27 = scalar_lea.hbm %s355_s0, 64 }
   0x6   :  { %s23_s24 = sshll.u32 %s248_s23, 4  ;;  %p155_p0 = scmp.ne.s32.totalorder %s355_s0, %s154_s27  ;;  %s24_s24 = int_to_ptr.vmem [resolvable:$true] %s23_s24 }
   0x7   :  { %p158_p1 = scmp.lt.u32.totalorder %s154_s27, %s355_s0 }
   0x9   :  { %p160_p2 = pnand %p158_p1, %p155_p0 }
   0xb   :  { %163 = shalt.err (!%p160_p2)
}
   0xc   :  { %s164_s3 = scalar_lea.vmem %s24_s24, 64  ;;  %p169_p4 = scmp.lt.s32.totalorder %s24_s24, %s24_s24 }
   0xd   :  { %p165_p3 = scmp.ne.s32.totalorder %s24_s24, %s164_s3  ;;  %p170_p5 = scmp.lt.s32.totalorder %s164_s3, %s164_s3 }
   0xf   :  { %p171_p6 = por %p170_p5, %p169_p4 }
  0x11   :  { %p172_p7 = pnand %p171_p6, %p165_p3 }
  0x13   :  { %175 = shalt.err (!%p172_p7)
}
  0x14   :  { %26 = dma.hbm_to_vmem [thread:$0]  %s355_s0, 64, %s24_s24, [#allocation4]  }
  0x15   :  { %242 = dma.done.wait [#allocation4], 64  }
  0x16   :  { %243 = vsyncadd [#allocation4], 4294967232  ;;  %vm37_vm0 = vcmask 1043456   ;;  %v304_v1 = vld [vmem:[#allocation3] sm:$0xf]  ;;  %s249_s0 = smov 32  }
  0x17   :  { %v38_v2 = vsel %vm37_vm0, %v304_v1, 0.0  ;;  %v53_v3 = vmul.f32 %v304_v1, %v304_v1  ;;  %v71_v10 = vld [vmem:[#allocation2] sm:$0x1]  ;;  %s250_s10 = smov 64   ;;  %s251_s14 = smov [#allocation7]  }
  0x18   :  { %v39_v4 = vrot.slane %v38_v2, 4  ;;  %142 = vpush %v71_v10  ;;  %v51_v22 = vld [vmem:[%s356_s1] sm:$0x1]  ;;  %s116_s15 = sshll.u32 %s251_s14, 4  ;;  %s252_s18 = smov [#allocation9]   ;;  %s117_s15 = int_to_ptr.vmem [resolvable:$true] %s116_s15 }
  0x19   :  { %v54_v5 = vsel %vm37_vm0, %v53_v3, 0.0  ;;  %v67_v27 = vld [vmem:[%s357_s2] sm:$0x1]  ;;  %s126_s19 = sshll.u32 %s252_s18, 4  ;;  %s176_s20 = scalar_lea.vmem %s117_s15, 16  ;;  %s127_s19 = int_to_ptr.vmem [resolvable:$true] %s126_s19 }
  0x1a   :  { %v40_v6 = vadd.f32 %v39_v4, %v38_v2  ;;  %v55_v7 = vrot.slane %v54_v5, 4  ;;  %p177_p8 = scmp.ne.s32.totalorder %s117_s15, %s176_s20  ;;  %s180_s1 = scalar_lea.vmem %s117_s15, 32 }
  0x1b   :  { %p181_p9 = scmp.lt.s32.totalorder %s117_s15, %s117_s15  ;;  %p182_p10 = scmp.lt.s32.totalorder %s180_s1, %s176_s20 }
  0x1c   :  { %v41_v8 = vrot.slane %v40_v6, 2  ;;  %v56_v9 = vadd.f32 %v55_v7, %v54_v5 }
  0x1d   :  { %p183_p11 = por %p182_p10, %p181_p9 }
  0x1e   :  { %v42_v11 = vadd.f32 %v41_v8, %v40_v6  ;;  %v57_v12 = vrot.slane %v56_v9, 2 }
  0x1f   :  { %p184_p12 = pnand %p183_p11, %p177_p8 }
  0x20   :  { %v43_v13 = vrot.slane %v42_v11, 1  ;;  %v58_v14 = vadd.f32 %v57_v12, %v56_v9 }
  0x22   :  { %v44_v15 = vadd.f32 %v43_v13, %v42_v11  ;;  %v59_v16 = vrot.slane %v58_v14, 1 }
  0x24   :  { %45 = vrot.lane.b32.xlu0 %v44_v15, %s249_s0  ;;  %v60_v17 = vadd.f32 %v59_v16, %v58_v14 }
  0x28   :  { %61 = vrot.lane.b32.xlu0 %v60_v17, %s249_s0 }
  0x49   :  { %s309_s11 = spop %142 }
  0x4a   :  { %v73_v25 = vstv %s309_s11 }
  0x96   :  { %v46_v18 = vpop.permute.xlu0 %45 }
  0x97   :  { %v47_v19 = vadd.f32 %v46_v18, %v44_v15 }
  0x99   :  { %48 = vrot.lane.b32.xlu1 %v47_v19, %s250_s10 }
  0x9a   :  { %v62_v20 = vpop.permute.xlu0 %61 }
  0x9b   :  { %v63_v21 = vadd.f32 %v62_v20, %v60_v17 }
  0x9d   :  { %64 = vrot.lane.b32.xlu1 %v63_v21, %s250_s10 }
 0x10b   :  { %v49_v23 = vpop.permute.xlu1 %48 }
 0x10c   :  { %v50_v24 = vadd.f32 %v49_v23, %v47_v19 }
 0x10e   :  { %v52_v26 = vadd.f32 %v51_v22, %v50_v24 }
 0x10f   :  { %v65_v28 = vpop.permute.xlu1 %64 }
 0x110   :  { %69 = vst [vmem:[#allocation7] sm:$0x1] %v52_v26  ;;  %v74_v29 = vmul.f32 %v73_v25, %v52_v26  ;;  %v66_v30 = vadd.f32 %v65_v28, %v63_v21 }
 0x111   :  { %187 = shalt.err (!%p184_p12)
}
 0x112   :  { %s188_s23 = scalar_lea.hbm %s360_s5, 16 }
 0x113   :  { %p189_p13 = scmp.ne.s32.totalorder %s360_s5, %s188_s23  ;;  %p192_p0 = scmp.lt.u32.totalorder %s188_s23, %s360_s5 }
 0x115   :  { %p194_p1 = pnand %p192_p0, %p189_p13 }
 0x117   :  { %197 = shalt.err (!%p194_p1)
}
 0x118   :  { %119 = dma.vmem_to_hbm [thread:$0]  %s117_s15, 16, %s360_s5, [#allocation8]   ;;  %v68_v31 = vadd.f32 %v67_v27, %v66_v30  ;;  %v76_v32 = vmul.f32 %v74_v29, %v74_v29 }
 0x119   :  { %s198_s29 = scalar_lea.vmem %s127_s19, 16  ;;  %s202_s30 = scalar_lea.vmem %s127_s19, 32 }
 0x11a   :  { %v75_v33 = vmul.f32 %v73_v25, %v68_v31  ;;  %70 = vst [vmem:[#allocation9] sm:$0x1] %v68_v31  ;;  %p199_p2 = scmp.ne.s32.totalorder %s127_s19, %s198_s29  ;;  %p203_p3 = scmp.lt.s32.totalorder %s127_s19, %s127_s19 }
 0x11b   :  { %p204_p4 = scmp.lt.s32.totalorder %s202_s30, %s198_s29 }
 0x11d   :  { %p205_p5 = por %p204_p4, %p203_p3 }
 0x11f   :  { %p206_p6 = pnand %p205_p5, %p199_p2 }
 0x121   :  { %209 = shalt.err (!%p206_p6)
}
 0x122   :  { %s210_s8 = scalar_lea.hbm %s361_s6, 16 }
 0x123   :  { %p211_p7 = scmp.ne.s32.totalorder %s361_s6, %s210_s8  ;;  %p214_p8 = scmp.lt.u32.totalorder %s210_s8, %s361_s6 }
 0x125   :  { %p216_p9 = pnand %p214_p8, %p211_p7 }
 0x127   :  { %219 = shalt.err (!%p216_p9)
}
 0x128   :  { %129 = dma.vmem_to_hbm [thread:$0]  %s127_s19, 16, %s361_s6, [#allocation8]   ;;  %v77_v34 = vsub.f32 %v75_v33, %v76_v32  ;;  %v89_v38 = vlaneseq }
 0x129   :  { %s253_s13 = smov [#allocation6]  }
 0x12a   :  { %v78_v35 = vmax.f32 %v77_v34, 0.0  ;;  %v90_v43 = vshrl.u32 %v89_v38, 7  ;;  %s106_s14 = sshll.u32 %s253_s13, 4  ;;  %s107_s14 = int_to_ptr.vmem [resolvable:$true] %s106_s14 }
 0x12b   :  { %s220_s6 = scalar_lea.vmem %s107_s14, 64  ;;  %p225_p11 = scmp.lt.s32.totalorder %s107_s14, %s107_s14 }
 0x12c   :  { %150 = vrsqrt.f32 %v78_v35  ;;  %vm81_vm1 = vcmp.eq.f32.partialorder %v78_v35, inf  ;;  %v84_v39 = vand.u32 2147483648, %v78_v35  ;;  %vm83_vm2 = vcmp.eq.f32.partialorder %v78_v35, 0.0  ;;  %p221_p10 = scmp.ne.s32.totalorder %s107_s14, %s220_s6  ;;  %p226_p12 = scmp.lt.s32.totalorder %s220_s6, %s220_s6 }
 0x12d   :  { %v91_v44 = vsub.s32 0, %v90_v43 }
 0x12e   :  { %p227_p13 = por %p226_p12, %p225_p11 }
 0x12f   :  { %v92_v45 = vrot.slane %v74_v29, %v91_v44 }
 0x130   :  { %p228_p0 = pnand %p227_p13, %p221_p10 }
 0x131   :  { %v93_v47 = vsub.f32 %v304_v1, %v92_v45 }
 0x136   :  { %v151_v36 = vpop.eup %150 }
 0x137   :  { %v80_v37 = vmul.f32 %v151_v36, %v78_v35 }
 0x139   :  { %v82_v40 = vsel %vm81_vm1, %v78_v35, %v80_v37 }
 0x13a   :  { %v85_v41 = vsel %vm83_vm2, %v84_v39, %v82_v40 }
 0x13b   :  { %v86_v42 = vmax.f32 %v85_v41, 1e-08 }
 0x13d   :  { %152 = vrcp.f32 %v86_v42 }
 0x147   :  { %v153_v46 = vpop.eup %152 }
 0x148   :  { %v97_v48 = vrot.slane %v153_v46, %v91_v44 }
 0x14a   :  { %v98_v49 = vmul.f32 %v97_v48, %v93_v47 }
 0x14c   :  { %99 = vst [vmem:[#allocation6] sm:$0xf] %v98_v49 }
 0x14d   :  { %231 = shalt.err (!%p228_p0)
}
 0x14e   :  { %s232_s17 = scalar_lea.hbm %s359_s4, 64 }
 0x14f   :  { %p233_p1 = scmp.ne.s32.totalorder %s359_s4, %s232_s17  ;;  %p236_p2 = scmp.lt.u32.totalorder %s232_s17, %s359_s4 }
 0x151   :  { %p238_p3 = pnand %p236_p2, %p233_p1 }
 0x153   :  { %241 = shalt.err (!%p238_p3)
}
 0x154   :  { %109 = dma.vmem_to_hbm [thread:$0]  %s107_s14, 64, %s359_s4, [#allocation5]  }
 0x155   :  { %244 = dma.done.wait [#allocation5], 64  }
 0x156   :  { %245 = vsyncadd [#allocation5], 4294967232 }
 0x157   :  { %246 = dma.done.wait [#allocation8], 32  }
 0x158   :  { %247 = vsyncadd [#allocation8], 4294967264 }
 0x159   :  { %139 = vsyncpa [#allocation4], 1 }
 0x15a   :  { %140 = vsyncpa [#allocation5], 1 }
 0x15b   :  { %141 = vsyncpa [#allocation8], 1 }

</bundles_post_ra>
